<compile_context>
chip_gen: v7x
topology: tpu7x:2x2x1
jax: 0.10.0
libtpu: 0.0.40
codegen_flags: <defaults>
</compile_context>

<pallas_src>
import math
import functools

import jax
import jax.numpy as jnp
from jax.experimental import pallas as pl
from jax.experimental.pallas import tpu as pltpu


def _flash_attn_fc_kernel(q_ref, k_ref, v_ref, bias_ref, wfc_ref, bfc_ref,
                          out_ref, m_sc, l_sc, acc_sc):
    """One (batch, q-tile, k-tile) grid step.

    q_ref    : (1, H, TQ, D) bf16   projected queries (q-tile)
    k_ref    : (1, H, TK, D) bf16   projected keys    (k-tile)
    v_ref    : (1, H, TK, D) bf16   projected values  (k-tile)
    bias_ref : (1, TQ, TK)   bf16   additive mask bias (0 / -1e20), head-invariant
    wfc_ref  : (H, D, E)     bf16   fc weight (W.T) split per head
    bfc_ref  : (1, E)        f32    fc bias
    out_ref  : (1, TQ, E)    f32
    m/l/acc  : (H,TQ,1)/(H,TQ,1)/(H,TQ,D) f32 running online-softmax state
    """
    ki = pl.program_id(2)
    H, D, E = wfc_ref.shape
    scale = jnp.float32(1.0 / math.sqrt(H * D))      # 1 / sqrt(embed_size)
    f32, bf16 = jnp.float32, jnp.bfloat16

    @pl.when(ki == 0)
    def _():
        m_sc[...] = jnp.full_like(m_sc, -jnp.inf)
        l_sc[...] = jnp.zeros_like(l_sc)
        acc_sc[...] = jnp.zeros_like(acc_sc)

    # Energy for this (q-tile, k-tile), all heads batched: (H, TQ, TK), f32 MXU acc.
    s = jnp.einsum('hqd,hkd->hqk', q_ref[0], k_ref[0], preferred_element_type=f32)
    # Additive mask bias BEFORE scaling (matches torch.masked_fill then / sqrt(E)).
    s = s + bias_ref[0].astype(f32)[None, :, :]
    logits = s * scale

    # Online (flash) softmax update, all in f32.
    m_prev = m_sc[...]
    m_new = jnp.maximum(m_prev, jnp.max(logits, axis=-1, keepdims=True))
    alpha = jnp.exp(m_prev - m_new)
    p = jnp.exp(logits - m_new)
    l_sc[...] = alpha * l_sc[...] + jnp.sum(p, axis=-1, keepdims=True)
    acc_sc[...] = alpha * acc_sc[...] + jnp.einsum(
        'hqk,hkd->hqd', p.astype(bf16), v_ref[0], preferred_element_type=f32)
    m_sc[...] = m_new

    # Finalize: softmax normalization + fused head-concat + fc, once per q-tile.
    @pl.when(ki == pl.num_programs(2) - 1)
    def _():
        inv_l = pl.reciprocal(l_sc[...], approx=True)          # (H, TQ, 1), EUP slot
        ctx = (acc_sc[...] * inv_l).astype(bf16)               # (H, TQ, D)
        # concat_h(ctx) @ Wfc.T == sum_h ctx[h] @ Wfc.T[h*D:(h+1)*D]
        # Unrolled per-head accumulation: no (H, TQ, E) intermediate, no head-sum pass.
        acc = jnp.dot(ctx[0], wfc_ref[0], preferred_element_type=f32)
        for h in range(1, H):
            acc = acc + jnp.dot(ctx[h], wfc_ref[h], preferred_element_type=f32)
        out_ref[0] = (acc + bfc_ref[...]).astype(out_ref.dtype)


def self_attention_pallas(values, keys, query, mask, params, *, heads):
    """values/keys/query: (N, L, E) float32; mask: (N, Lq, Lk) (0 = masked) or None."""
    N, Lv, E = values.shape
    _, Lk, _ = keys.shape
    _, Lq, _ = query.shape
    assert Lv == Lk
    H = heads
    D = E // H
    assert D * H == E

    wv, wk, wq, wfc, bfc = params
    bf16 = jnp.bfloat16

    # ---- wrapper-side XLA glue ----------------------------------------------
    # Per-head Q/K/V projections hoisted out of the kernel: they depend only on
    # the batch (not on the q-tile), so doing them in-kernel recomputed K/V per
    # q-tile.  XLA runs them as one lane-dense batched matmul each.
    def project(x, w, L):
        xh = x.reshape(N, L, H, D)
        y = jnp.einsum('nlhd,ed->nlhe', xh, w)                 # nn.Linear: x @ W.T
        return jnp.transpose(y, (0, 2, 1, 3)).astype(bf16)     # (N, H, L, D) bf16

    v_p = project(values, wv, Lv)
    k_p = project(keys, wk, Lk)
    q_p = project(query, wq, Lq)

    # fc weight: transposed + split per head so head-concat + fc fuses in-kernel.
    wfc_h = wfc.T.reshape(H, D, E).astype(bf16)
    bfc2d = bfc.reshape(1, E).astype(jnp.float32)

    # Mask -> additive bf16 bias (0 where kept, -1e20 where masked), head-invariant.
    if mask is None:
        bias = jnp.zeros((N, Lq, Lk), bf16)
    else:
        m = mask
        if m.ndim == 4:
            # TODO(synk): truly per-head masks would need the head dim back; the
            # module is normally used with head-invariant masks.
            m = m[:, 0]
        m = jnp.broadcast_to(m, (N, Lq, Lk))
        bias = jnp.where(m == 0, -1e20, 0.0).astype(bf16)

    # ---- tiling ---------------------------------------------------------------
    # TQ = TK = 128 fills a v5e MXU pass and keeps per-step VMEM at ~2 MiB, far
    # under v7x's 64 MiB physical VMEM.  On v6e (128 MiB, 256-wide MXU) TQ=256
    # would halve grid-step overhead.
    TQ = min(Lq, 128)
    TK = min(Lk, 128)
    qn = pl.cdiv(Lq, TQ)
    kn = pl.cdiv(Lk, TK)
    Lq_p, Lk_p = qn * TQ, kn * TK

    if Lk_p != Lk:  # pad keys/values; padded key columns are masked out via the bias
        pk = Lk_p - Lk
        k_p = jnp.pad(k_p, ((0, 0), (0, 0), (0, pk), (0, 0)))
        v_p = jnp.pad(v_p, ((0, 0), (0, 0), (0, pk), (0, 0)))
        bias = jnp.pad(bias, ((0, 0), (0, 0), (0, pk)), constant_values=-1e20)
    if Lq_p != Lq:  # padded query rows are computed but sliced off below
        pq = Lq_p - Lq
        q_p = jnp.pad(q_p, ((0, 0), (0, 0), (0, pq), (0, 0)))
        bias = jnp.pad(bias, ((0, 0), (0, pq), (0, 0)))

    # Advisory cost estimate so XLA schedules the surrounding transposes/casts well.
    flops = 4 * N * H * Lq_p * Lk_p * D + 2 * N * Lq_p * E * E
    bytes_accessed = (q_p.nbytes + (k_p.nbytes + v_p.nbytes) * qn + bias.nbytes
                      + wfc_h.nbytes + bfc2d.nbytes + N * Lq_p * E * 4)
    cost = pl.CostEstimate(flops=flops,
                           transcendentals=N * H * Lq_p * Lk_p,
                           bytes_accessed=bytes_accessed)

    # TODO(synk): on v7x, pick TQ so that N*qn is even to keep both TensorCores busy.
    out = pl.pallas_call(
        _flash_attn_fc_kernel,
        out_shape=jax.ShapeDtypeStruct((N, Lq_p, E), jnp.float32),
        grid_spec=pltpu.PrefetchScalarGridSpec(
            num_scalar_prefetch=0,
            grid=(N, qn, kn),
            in_specs=[
                pl.BlockSpec((1, H, TQ, D), lambda n, qi, ki: (n, 0, qi, 0)),  # q
                pl.BlockSpec((1, H, TK, D), lambda n, qi, ki: (n, 0, ki, 0)),  # k
                pl.BlockSpec((1, H, TK, D), lambda n, qi, ki: (n, 0, ki, 0)),  # v
                pl.BlockSpec((1, TQ, TK), lambda n, qi, ki: (n, qi, ki)),      # bias
                pl.BlockSpec((H, D, E), lambda n, qi, ki: (0, 0, 0)),          # Wfc.T per-head
                pl.BlockSpec((1, E), lambda n, qi, ki: (0, 0)),                # b_fc
            ],
            out_specs=pl.BlockSpec((1, TQ, E), lambda n, qi, ki: (n, qi, 0)),
            scratch_shapes=[
                pltpu.VMEM((H, TQ, 1), jnp.float32),   # running max
                pltpu.VMEM((H, TQ, 1), jnp.float32),   # running denominator
                pltpu.VMEM((H, TQ, D), jnp.float32),   # running numerator (ctx)
            ]),
        compiler_params=pltpu.CompilerParams(
            dimension_semantics=("parallel", "parallel", "arbitrary"),
            vmem_limit_bytes=64 * 1024 * 1024),
        cost_estimate=cost,
    )(q_p, k_p, v_p, bias, wfc_h, bfc2d)

    return out[:, :Lq] if Lq_p != Lq else out


def self_attention_reference(values, keys, query, mask, params, *, heads):
    """Pure-JAX f32 mirror of the PyTorch forward, for verification."""
    wv, wk, wq, wfc, bfc = params
    N, Lv, E = values.shape
    Lk = keys.shape[1]
    Lq = query.shape[1]
    D = E // heads
    H = heads

    v = values.reshape(N, Lv, H, D)
    k = keys.reshape(N, Lk, H, D)
    q = query.reshape(N, Lq, H, D)

    v = jnp.einsum('nlhd,ed->nlhe', v, wv)   # Linear: x @ W.T
    k = jnp.einsum('nlhd,ed->nlhe', k, wk)
    q = jnp.einsum('nlhd,ed->nlhe', q, wq)

    energy = jnp.einsum('nqhd,nkhd->nhqk', q, k)
    if mask is not None:
        m = mask if mask.ndim == 4 else mask[:, None, :, :]
        energy = jnp.where(m == 0, jnp.float32(-1e20), energy)
    attn = jax.nn.softmax(energy / math.sqrt(E), axis=3)
    out = jnp.einsum('nhql,nlhd->nqhd', attn, v).reshape(N, Lq, E)
    return jnp.einsum('nqe,fe->nqf', out, wfc) + bfc


if __name__ == "__main__":
    # small shapes: batch=2, seq=8, embed=32, heads=2 (head_dim=16)
    N, L, E, H = 2, 8, 32, 2
    D = E // H

    key = jax.random.PRNGKey(0)
    ks = jax.random.split(key, 9)

    values = jax.random.normal(ks[0], (N, L, E), jnp.float32)
    keys_in = jax.random.normal(ks[1], (N, L, E), jnp.float32)
    query = jax.random.normal(ks[2], (N, L, E), jnp.float32)

    # lower-triangular (causal-style) mask, shared across heads: (N, Lq, Lk); 0 = masked
    base_mask = jnp.tril(jnp.ones((L, L), jnp.int32))
    mask = jnp.broadcast_to(base_mask[None], (N, L, L)).astype(jnp.int32)

    # deterministic parameter init (PyTorch Linear weight layout: (out, in))
    wv = jax.random.normal(ks[3], (D, D), jnp.float32) * (1.0 / math.sqrt(D))
    wk = jax.random.normal(ks[4], (D, D), jnp.float32) * (1.0 / math.sqrt(D))
    wq = jax.random.normal(ks[5], (D, D), jnp.float32) * (1.0 / math.sqrt(D))
    wfc = jax.random.normal(ks[6], (E, E), jnp.float32) * (1.0 / math.sqrt(E))
    bfc = jax.random.normal(ks[7], (E,), jnp.float32) * 0.01
    params = (wv, wk, wq, wfc, bfc)

    run = jax.jit(functools.partial(self_attention_pallas, heads=H))
    out = run(values, keys_in, query, mask, params)
    out = jax.block_until_ready(out)

    ref = self_attention_reference(values, keys_in, query, mask, params, heads=H)
    assert out.shape == (N, L, E)
    # bf16 MXU operands, additive -1e20 mask bias and approx reciprocal -> compare
    # to the f32 reference with a correspondingly looser tolerance.
    assert jnp.allclose(out, ref, atol=5e-2, rtol=5e-2), "mismatch vs reference"

    print("KERNEL_OK")
</pallas_src>

<mosaic_0001>
module attributes {stable_mosaic.version = 11 : i64} {
  func.func @_flash_attn_fc_kernel(%arg0: i32, %arg1: i32, %arg2: i32, %arg3: memref<1x2x8x16xbf16, #tpu.memory_space<vmem>>, %arg4: memref<1x2x8x16xbf16, #tpu.memory_space<vmem>>, %arg5: memref<1x2x8x16xbf16, #tpu.memory_space<vmem>>, %arg6: memref<1x8x8xbf16, #tpu.memory_space<vmem>>, %arg7: memref<2x16x32xbf16, #tpu.memory_space<vmem>>, %arg8: memref<1x32xf32, #tpu.memory_space<vmem>>, %arg9: memref<1x8x32xf32, #tpu.memory_space<vmem>>, %arg10: memref<2x8x1xf32, #tpu.memory_space<vmem>>, %arg11: memref<2x8x1xf32, #tpu.memory_space<vmem>>, %arg12: memref<2x8x16xf32, #tpu.memory_space<vmem>>) attributes {dimension_semantics = [#tpu.dimension_semantics<parallel>, #tpu.dimension_semantics<parallel>, #tpu.dimension_semantics<arbitrary>], iteration_bounds = array<i64: 2, 1, 1>, scalar_prefetch = 0 : i64, scratch_operands = 3 : i64, tpu.core_type = #tpu.core_type<tc>, window_params = [{transform_indices = @transform_0, window_bounds = array<i64: 1, 2, 8, 16>}, {transform_indices = @transform_1, window_bounds = array<i64: 1, 2, 8, 16>}, {transform_indices = @transform_2, window_bounds = array<i64: 1, 2, 8, 16>}, {transform_indices = @transform_3, window_bounds = array<i64: 1, 8, 8>}, {pipeline_mode = #tpu.pipeline_mode<synchronous>, transform_indices = @transform_4, window_bounds = array<i64: 2, 16, 32>}, {pipeline_mode = #tpu.pipeline_mode<synchronous>, transform_indices = @transform_5, window_bounds = array<i64: 1, 32>}, {transform_indices = @transform_6, window_bounds = array<i64: 1, 8, 32>}]} {
    %c0_i32 = arith.constant 0 : i32
    %0 = arith.cmpi eq, %arg2, %c0_i32 : i32
    %1 = arith.extui %0 : i1 to i32
    %c0_i32_0 = arith.constant 0 : i32
    %2 = arith.cmpi ne, %1, %c0_i32_0 : i32
    scf.if %2 {
      %cst_39 = arith.constant 0xFF800000 : f32
      %44 = vector.broadcast %cst_39 : f32 to vector<2x8x1xf32>
      %c0_40 = arith.constant 0 : index
      %c0_41 = arith.constant 0 : index
      %c0_42 = arith.constant 0 : index
      %45 = vector.load %arg10[%c0_40, %c0_41, %c0_42] : memref<2x8x1xf32, #tpu.memory_space<vmem>>, vector<2x8x1xf32>
      tpu.vector_store %arg10[%c0_40, %c0_41, %c0_42], %44 {strides = array<i32>} : memref<2x8x1xf32, #tpu.memory_space<vmem>>, vector<2x8x1xf32>,
      %cst_43 = arith.constant 0.000000e+00 : f32
      %46 = vector.broadcast %cst_43 : f32 to vector<2x8x1xf32>
      %c0_44 = arith.constant 0 : index
      %c0_45 = arith.constant 0 : index
      %c0_46 = arith.constant 0 : index
      %47 = vector.load %arg11[%c0_44, %c0_45, %c0_46] : memref<2x8x1xf32, #tpu.memory_space<vmem>>, vector<2x8x1xf32>
      tpu.vector_store %arg11[%c0_44, %c0_45, %c0_46], %46 {strides = array<i32>} : memref<2x8x1xf32, #tpu.memory_space<vmem>>, vector<2x8x1xf32>,
      %cst_47 = arith.constant 0.000000e+00 : f32
      %48 = vector.broadcast %cst_47 : f32 to vector<2x8x16xf32>
      %c0_48 = arith.constant 0 : index
      %c0_49 = arith.constant 0 : index
      %c0_50 = arith.constant 0 : index
      %49 = vector.load %arg12[%c0_48, %c0_49, %c0_50] : memref<2x8x16xf32, #tpu.memory_space<vmem>>, vector<2x8x16xf32>
      tpu.vector_store %arg12[%c0_48, %c0_49, %c0_50], %48 {strides = array<i32>} : memref<2x8x16xf32, #tpu.memory_space<vmem>>, vector<2x8x16xf32>,
    } else {
    }
    %c0 = arith.constant 0 : index
    %c0_1 = arith.constant 0 : index
    %c0_2 = arith.constant 0 : index
    %c0_3 = arith.constant 0 : index
    %3 = vector.load %arg3[%c0, %c0_1, %c0_2, %c0_3] : memref<1x2x8x16xbf16, #tpu.memory_space<vmem>>, vector<1x2x8x16xbf16>
    %4 = vector.shape_cast %3 : vector<1x2x8x16xbf16> to vector<2x8x16xbf16>
    %c0_4 = arith.constant 0 : index
    %c0_5 = arith.constant 0 : index
    %c0_6 = arith.constant 0 : index
    %c0_7 = arith.constant 0 : index
    %5 = vector.load %arg4[%c0_4, %c0_5, %c0_6, %c0_7] : memref<1x2x8x16xbf16, #tpu.memory_space<vmem>>, vector<1x2x8x16xbf16>
    %6 = vector.shape_cast %5 : vector<1x2x8x16xbf16> to vector<2x8x16xbf16>
    "tpu.trace_start"() <{level = 10 : i32, message = "hqd,hkd->hqk"}> : () -> ()
    %cst = arith.constant dense<0.000000e+00> : vector<2x8x8xf32>
    %7 = tpu.matmul %4, %6, %cst {dimension_numbers = #tpu.dot_dimension_numbers<[2], [2], [1], [1], [0, 0, 0, 1, 1, 1], [0], [0]>} : vector<2x8x16xbf16>, vector<2x8x16xbf16>, vector<2x8x8xf32> -> vector<2x8x8xf32>
    "tpu.trace_stop"() : () -> ()
    %c0_8 = arith.constant 0 : index
    %c0_9 = arith.constant 0 : index
    %c0_10 = arith.constant 0 : index
    %8 = vector.load %arg6[%c0_8, %c0_9, %c0_10] : memref<1x8x8xbf16, #tpu.memory_space<vmem>>, vector<1x8x8xbf16>
    %9 = vector.shape_cast %8 : vector<1x8x8xbf16> to vector<8x8xbf16>
    %10 = arith.extf %9 : vector<8x8xbf16> to vector<8x8xf32>
    %11 = vector.shape_cast %10 : vector<8x8xf32> to vector<1x8x8xf32>
    %12 = vector.broadcast %11 : vector<1x8x8xf32> to vector<2x8x8xf32>
    %13 = arith.addf %7, %12 : vector<2x8x8xf32>
    %cst_11 = arith.constant 0.176776692 : f32
    %14 = vector.broadcast %cst_11 : f32 to vector<2x8x8xf32>
    %15 = arith.mulf %13, %14 : vector<2x8x8xf32>
    %c0_12 = arith.constant 0 : index
    %c0_13 = arith.constant 0 : index
    %c0_14 = arith.constant 0 : index
    %16 = vector.load %arg10[%c0_12, %c0_13, %c0_14] : memref<2x8x1xf32, #tpu.memory_space<vmem>>, vector<2x8x1xf32>
    %cst_15 = arith.constant dense<0xFF800000> : vector<2x8xf32>
    %17 = vector.multi_reduction <maximumf>, %15, %cst_15 [2] : vector<2x8x8xf32> to vector<2x8xf32>
    %18 = vector.shape_cast %17 : vector<2x8xf32> to vector<2x8x1xf32>
    %19 = arith.maximumf %16, %18 : vector<2x8x1xf32>
    %20 = arith.subf %16, %19 : vector<2x8x1xf32>
    %21 = math.exp %20 : vector<2x8x1xf32>
    %22 = vector.broadcast %19 : vector<2x8x1xf32> to vector<2x8x8xf32>
    %23 = arith.subf %15, %22 : vector<2x8x8xf32>
    %24 = math.exp %23 : vector<2x8x8xf32>
    %c0_16 = arith.constant 0 : index
    %c0_17 = arith.constant 0 : index
    %c0_18 = arith.constant 0 : index
    %25 = vector.load %arg11[%c0_16, %c0_17, %c0_18] : memref<2x8x1xf32, #tpu.memory_space<vmem>>, vector<2x8x1xf32>
    %26 = arith.mulf %21, %25 : vector<2x8x1xf32>
    %cst_19 = arith.constant dense<0.000000e+00> : vector<2x8xf32>
    %27 = vector.multi_reduction <add>, %24, %cst_19 [2] : vector<2x8x8xf32> to vector<2x8xf32>
    %28 = vector.shape_cast %27 : vector<2x8xf32> to vector<2x8x1xf32>
    %29 = arith.addf %26, %28 : vector<2x8x1xf32>
    %c0_20 = arith.constant 0 : index
    %c0_21 = arith.constant 0 : index
    %c0_22 = arith.constant 0 : index
    %30 = vector.load %arg11[%c0_20, %c0_21, %c0_22] : memref<2x8x1xf32, #tpu.memory_space<vmem>>, vector<2x8x1xf32>
    tpu.vector_store %arg11[%c0_20, %c0_21, %c0_22], %29 {strides = array<i32>} : memref<2x8x1xf32, #tpu.memory_space<vmem>>, vector<2x8x1xf32>,
    %c0_23 = arith.constant 0 : index
    %c0_24 = arith.constant 0 : index
    %c0_25 = arith.constant 0 : index
    %31 = vector.load %arg12[%c0_23, %c0_24, %c0_25] : memref<2x8x16xf32, #tpu.memory_space<vmem>>, vector<2x8x16xf32>
    %32 = vector.broadcast %21 : vector<2x8x1xf32> to vector<2x8x16xf32>
    %33 = arith.mulf %32, %31 : vector<2x8x16xf32>
    %34 = arith.truncf %24 : vector<2x8x8xf32> to vector<2x8x8xbf16>
    %c0_26 = arith.constant 0 : index
    %c0_27 = arith.constant 0 : index
    %c0_28 = arith.constant 0 : index
    %c0_29 = arith.constant 0 : index
    %35 = vector.load %arg5[%c0_26, %c0_27, %c0_28, %c0_29] : memref<1x2x8x16xbf16, #tpu.memory_space<vmem>>, vector<1x2x8x16xbf16>
    %36 = vector.shape_cast %35 : vector<1x2x8x16xbf16> to vector<2x8x16xbf16>
    "tpu.trace_start"() <{level = 10 : i32, message = "hqk,hkd->hqd"}> : () -> ()
    %cst_30 = arith.constant dense<0.000000e+00> : vector<2x8x16xf32>
    %37 = tpu.matmul %34, %36, %cst_30 {dimension_numbers = #tpu.dot_dimension_numbers<[2], [1], [1], [2], [0, 0, 0, 1, 1, 2], [0], [0]>} : vector<2x8x8xbf16>, vector<2x8x16xbf16>, vector<2x8x16xf32> -> vector<2x8x16xf32>
    "tpu.trace_stop"() : () -> ()
    %38 = arith.addf %33, %37 : vector<2x8x16xf32>
    %c0_31 = arith.constant 0 : index
    %c0_32 = arith.constant 0 : index
    %c0_33 = arith.constant 0 : index
    %39 = vector.load %arg12[%c0_31, %c0_32, %c0_33] : memref<2x8x16xf32, #tpu.memory_space<vmem>>, vector<2x8x16xf32>
    tpu.vector_store %arg12[%c0_31, %c0_32, %c0_33], %38 {strides = array<i32>} : memref<2x8x16xf32, #tpu.memory_space<vmem>>, vector<2x8x16xf32>,
    %c0_34 = arith.constant 0 : index
    %c0_35 = arith.constant 0 : index
    %c0_36 = arith.constant 0 : index
    %40 = vector.load %arg10[%c0_34, %c0_35, %c0_36] : memref<2x8x1xf32, #tpu.memory_space<vmem>>, vector<2x8x1xf32>
    tpu.vector_store %arg10[%c0_34, %c0_35, %c0_36], %19 {strides = array<i32>} : memref<2x8x1xf32, #tpu.memory_space<vmem>>, vector<2x8x1xf32>,
    %c0_i32_37 = arith.constant 0 : i32
    %41 = arith.cmpi eq, %arg2, %c0_i32_37 : i32
    %42 = arith.extui %41 : i1 to i32
    %c0_i32_38 = arith.constant 0 : i32
    %43 = arith.cmpi ne, %42, %c0_i32_38 : i32
    scf.if %43 {
      %c0_39 = arith.constant 0 : index
      %c0_40 = arith.constant 0 : index
      %c0_41 = arith.constant 0 : index
      %44 = vector.load %arg11[%c0_39, %c0_40, %c0_41] : memref<2x8x1xf32, #tpu.memory_space<vmem>>, vector<2x8x1xf32>
      %45 = tpu.reciprocal %44 {approx = true} : vector<2x8x1xf32> -> vector<2x8x1xf32>
      %c0_42 = arith.constant 0 : index
      %c0_43 = arith.constant 0 : index
      %c0_44 = arith.constant 0 : index
      %46 = vector.load %arg12[%c0_42, %c0_43, %c0_44] : memref<2x8x16xf32, #tpu.memory_space<vmem>>, vector<2x8x16xf32>
      %47 = vector.broadcast %45 : vector<2x8x1xf32> to vector<2x8x16xf32>
      %48 = arith.mulf %46, %47 : vector<2x8x16xf32>
      %49 = arith.truncf %48 : vector<2x8x16xf32> to vector<2x8x16xbf16>
      %50 = vector.extract_strided_slice %49 {offsets = [0, 0, 0], sizes = [1, 8, 16], strides = [1, 1, 1]} : vector<2x8x16xbf16> to vector<1x8x16xbf16>
      %51 = vector.shape_cast %50 : vector<1x8x16xbf16> to vector<8x16xbf16>
      %c0_45 = arith.constant 0 : index
      %c0_46 = arith.constant 0 : index
      %c0_47 = arith.constant 0 : index
      %52 = vector.load %arg7[%c0_45, %c0_46, %c0_47] : memref<2x16x32xbf16, #tpu.memory_space<vmem>>, vector<1x16x32xbf16>
      %53 = vector.shape_cast %52 : vector<1x16x32xbf16> to vector<16x32xbf16>
      %cst_48 = arith.constant dense<0.000000e+00> : vector<8x32xf32>
      %54 = tpu.matmul %51, %53, %cst_48 {dimension_numbers = #tpu.dot_dimension_numbers<[1], [0], [0], [1], [0, 0, 1, 1], [], []>} : vector<8x16xbf16>, vector<16x32xbf16>, vector<8x32xf32> -> vector<8x32xf32>
      %55 = vector.extract_strided_slice %49 {offsets = [1, 0, 0], sizes = [1, 8, 16], strides = [1, 1, 1]} : vector<2x8x16xbf16> to vector<1x8x16xbf16>
      %56 = vector.shape_cast %55 : vector<1x8x16xbf16> to vector<8x16xbf16>
      %c1 = arith.constant 1 : index
      %c0_49 = arith.constant 0 : index
      %c0_50 = arith.constant 0 : index
      %57 = vector.load %arg7[%c1, %c0_49, %c0_50] : memref<2x16x32xbf16, #tpu.memory_space<vmem>>, vector<1x16x32xbf16>
      %58 = vector.shape_cast %57 : vector<1x16x32xbf16> to vector<16x32xbf16>
      %cst_51 = arith.constant dense<0.000000e+00> : vector<8x32xf32>
      %59 = tpu.matmul %56, %58, %cst_51 {dimension_numbers = #tpu.dot_dimension_numbers<[1], [0], [0], [1], [0, 0, 1, 1], [], []>} : vector<8x16xbf16>, vector<16x32xbf16>, vector<8x32xf32> -> vector<8x32xf32>
      %60 = arith.addf %54, %59 : vector<8x32xf32>
      %c0_52 = arith.constant 0 : index
      %c0_53 = arith.constant 0 : index
      %61 = vector.load %arg8[%c0_52, %c0_53] : memref<1x32xf32, #tpu.memory_space<vmem>>, vector<1x32xf32>
      %62 = vector.broadcast %61 : vector<1x32xf32> to vector<8x32xf32>
      %63 = arith.addf %60, %62 : vector<8x32xf32>
      %c0_54 = arith.constant 0 : index
      %c0_55 = arith.constant 0 : index
      %c0_56 = arith.constant 0 : index
      %64 = vector.load %arg9[%c0_54, %c0_55, %c0_56] : memref<1x8x32xf32, #tpu.memory_space<vmem>>, vector<1x8x32xf32>
      %65 = vector.shape_cast %64 : vector<1x8x32xf32> to vector<8x32xf32>
      %66 = vector.shape_cast %63 : vector<8x32xf32> to vector<1x8x32xf32>
      tpu.vector_store %arg9[%c0_54, %c0_55, %c0_56], %66 {strides = array<i32>} : memref<1x8x32xf32, #tpu.memory_space<vmem>>, vector<1x8x32xf32>,
    } else {
    }
    return
  }
  func.func @transform_0(%arg0: i32, %arg1: i32, %arg2: i32) -> (i32, i32, i32, i32) {
    %c0_i32 = arith.constant 0 : i32
    %c0_i32_0 = arith.constant 0 : i32
    %c0_i32_1 = arith.constant 0 : i32
    return %arg0, %c0_i32, %arg1, %c0_i32_0 : i32, i32, i32, i32
  }
  func.func @transform_1(%arg0: i32, %arg1: i32, %arg2: i32) -> (i32, i32, i32, i32) {
    %c0_i32 = arith.constant 0 : i32
    %c0_i32_0 = arith.constant 0 : i32
    %c0_i32_1 = arith.constant 0 : i32
    return %arg0, %c0_i32, %arg2, %c0_i32_0 : i32, i32, i32, i32
  }
  func.func @transform_2(%arg0: i32, %arg1: i32, %arg2: i32) -> (i32, i32, i32, i32) {
    %c0_i32 = arith.constant 0 : i32
    %c0_i32_0 = arith.constant 0 : i32
    %c0_i32_1 = arith.constant 0 : i32
    return %arg0, %c0_i32, %arg2, %c0_i32_0 : i32, i32, i32, i32
  }
  func.func @transform_3(%arg0: i32, %arg1: i32, %arg2: i32) -> (i32, i32, i32) {
    %c0_i32 = arith.constant 0 : i32
    return %arg0, %arg1, %arg2 : i32, i32, i32
  }
  func.func @transform_4(%arg0: i32, %arg1: i32, %arg2: i32) -> (i32, i32, i32) {
    %c0_i32 = arith.constant 0 : i32
    %c0_i32_0 = arith.constant 0 : i32
    %c0_i32_1 = arith.constant 0 : i32
    %c0_i32_2 = arith.constant 0 : i32
    return %c0_i32, %c0_i32_0, %c0_i32_1 : i32, i32, i32
  }
  func.func @transform_5(%arg0: i32, %arg1: i32, %arg2: i32) -> (i32, i32) {
    %c0_i32 = arith.constant 0 : i32
    %c0_i32_0 = arith.constant 0 : i32
    %c0_i32_1 = arith.constant 0 : i32
    return %c0_i32, %c0_i32_0 : i32, i32
  }
  func.func @transform_6(%arg0: i32, %arg1: i32, %arg2: i32) -> (i32, i32, i32) {
    %c0_i32 = arith.constant 0 : i32
    %c0_i32_0 = arith.constant 0 : i32
    return %arg0, %arg1, %c0_i32 : i32, i32, i32
  }
}

</mosaic_0001>

<bundles_post_ra>
// kernel: self_attention_pallas.1
= control target key start
LH: loop header
LB: loop body
LE: loop exit
PB: predicated region body
PF: predicated region fallthrough
CT: control target
= control target key end

     0   :  { %s2037_s0 = inlined_call_operand.hbm [shape: bf16[2,2,8,16], index: 0, kind: input, shape index: {}]   ;;  %s2038_s1 = inlined_call_operand.hbm [shape: bf16[2,2,8,16], index: 1, kind: input, shape index: {}]   ;;  %s2039_s2 = inlined_call_operand.hbm [shape: bf16[2,2,8,16], index: 2, kind: input, shape index: {}]   ;;  %s2040_s3 = inlined_call_operand.hbm [shape: bf16[2,8,8], index: 3, kind: input, shape index: {}]   ;;  %s2041_s4 = inlined_call_operand.hbm [shape: bf16[2,16,32], index: 4, kind: input, shape index: {}]   ;;  %s2042_s5 = inlined_call_operand.hbm [shape: f32[1,32], index: 5, kind: input, shape index: {}]   ;;  %s2043_s6 = inlined_call_operand.hbm [shape: f32[2,8,32], index: 6, kind: output, shape index: {}]  }
   0x1   :  { %2068 = sst [smem:[#allocation29_spill]] %s2038_s1 }
   0x2   :  { %2069 = sst [smem:[#allocation30_spill]] %s2041_s4 }
   0x3   :  { %2070 = sst [smem:[#allocation31_spill]] %s2042_s5 }
   0x4   :  { %2071 = sst [smem:[#allocation32_spill]] %s2043_s6 }
   0x5   :  { %11 = vsyncpa [#allocation6], 0 }
   0x6   :  { %13 = vsyncpa [#allocation6 + $0x1], 0 }
   0x7   :  { %14 = vsyncpa [#allocation9], 0 }
   0x8   :  { %16 = vsyncpa [#allocation9 + $0x1], 0 }
   0x9   :  { %17 = vsyncpa [#allocation12], 0 }
   0xa   :  { %19 = vsyncpa [#allocation12 + $0x1], 0 }
   0xb   :  { %20 = vsyncpa [#allocation15], 0 }
   0xc   :  { %21 = vsyncpa [#allocation7], 0 }
   0xd   :  { %23 = vsyncpa [#allocation7 + $0x1], 0  ;;  %s1585_s21 = smov 0   ;;  %s1587_s22 = smov 0  }
   0xe   :  { %s1589_s23 = smov 0   ;;  %s1591_s24 = smov 0  }
   0xf   :  { %s1593_s25 = smov 0   ;;  %s1595_s26 = smov 0  }
  0x10 LB: > { %2072 = sst [smem:[#allocation23_spill]] %s1515_s21  ;;  %s1616_s27 = sadd.s32 4294967295, %s1535_s26   ;;  %s1535_s26 = sphi %s1595_s26, %s29_s26   ;;  %s1531_s25 = sphi %s1593_s25, %s2120_s25   ;;  %s1527_s24 = sphi %s1591_s24, %s2119_s24   ;;  %s1523_s23 = sphi %s1589_s23, %s2115_s23   ;;  %s1519_s22 = sphi %s1587_s22, %s2118_s22   ;;  %s1515_s21 = sphi %s1585_s21, %s2117_s21  }
  0x11   : > { %2073 = sst [smem:[#allocation24_spill]] %s1523_s23  ;;  %s1053_s28 = sadd.s32 4294967294, %s1535_s26  }
  0x12   : > { %p64_p0 = scmp.ne.s32.totalorder %s1523_s23, %s1519_s22  ;;  %p65_p1 = scmp.eq.s32.totalorder %s1535_s26, 0 }
  0x13   : > { %p70_p2 = scmp.ne.s32.totalorder %s1519_s22, %s1515_s21  ;;  %p2044_p3 = scmp.eq.s32.totalorder %s1616_s27, 0 }
  0x14   : > { %p224_p4 = scmp.eq.s32.totalorder %s1616_s27, 1  ;;  %p1627_p5 = por %p65_p1, %p64_p0 }
  0x15   : > { %p230_p6 = scmp.eq.s32.totalorder %s1053_s28, 1  ;;  %p1633_p7 = por %p2044_p3, %p70_p2 }
  0x16   : > { %p1637_p8 = por %p224_p4, %p64_p0  ;;  %p1054_p10 = scmp.ge.s32.totalorder %s1535_s26, 1 }
  0x17   : > { %s2075_s7 = scalar_select %p1633_p7, 1, 0 }
  0x18   : > { %s2076_s8 = scalar_select %p1637_p8, 1, 0 }
  0x19   : > { %p1641_p9 = por %p230_p6, %p70_p2  ;;  %p237_p11 = scmp.lt.s32.totalorder %s1535_s26, 3 }
  0x1a   : > { %2077 = sst [smem:[#allocation25_spill]] %s2076_s8  ;;  %s1537_s11 = smov [#allocation13]  }
  0x1b   : > { %s2078_s9 = scalar_select %p1641_p9, 1, 0 }
  0x1c   : > { %p1647_p12 = pnand %p1054_p10, %p237_p11  ;;  %s249_s12 = sshll.u32 %s1537_s11, 4  ;;  %s1651_s12 = int_to_ptr.vmem [resolvable:$true] %s249_s12 }
  0x1d   : > { %2079 = sst [smem:[#allocation26_spill]] %s2078_s9  ;;  %s48_s14 = sadd.s32 1, %s1531_s25 }
  0x1e   : > { %s2080_s10 = scalar_select %p1647_p12, 1, 0 }
  0x1f   : > { %p1159_p13 = pneg %p1647_p12  ;;  %s1665_s15 = sand.u32 1, %s1523_s23  }
  0x20   : > { %p1667_p4 = scmp.ge.s32.totalorder %s48_s14, 2  ;;  %s2083_s4 = sld [smem:[#allocation30_spill]] }
  0x21   : > { %p1659_p2 = pnand %p1159_p13, %p2044_p3 }
  0x23   : > { %s2081_s13 = scalar_select %p1659_p2, 1, 0 }
  0x24   : > { %p2057_p10 = pneg %p1659_p2 }
  0x26   : > { %s1261_s19 = scalar_lea.hbm %s2083_s4, 256 }
  0x27   : > { %p1262_p6 = scmp.ne.s32.totalorder %s2083_s4, %s1261_s19  ;;  %p1268_p0 = scmp.lt.u32.totalorder %s1261_s19, %s2083_s4 }
  0x29   : > { %p1264_p11 = pnand %p2057_p10, %p1262_p6 }
  0x2b   : > { %p1265_p13 = pneg %p1264_p11 }
  0x2d   : > { %p1270_p3 = pnand %p1268_p0, %p1265_p13 }
  0x2f   : > { %1273 = shalt.err (!%p1270_p3)
}
  0x30   : > { %s1274_s17 = scalar_lea.vmem %s1651_s12, 256  ;;  %p1282_p7 = scmp.lt.s32.totalorder %s1651_s12, %s1651_s12 }
  0x31   : > { %p1275_p1 = scmp.ne.s32.totalorder %s1651_s12, %s1274_s17  ;;  %p1283_p6 = scmp.lt.s32.totalorder %s1274_s17, %s1274_s17 }
  0x33   : > { %p1277_p9 = pnand %p1275_p1, %p2057_p10  ;;  %p1284_p11 = por %p1283_p6, %p1282_p7 }
  0x35   : > { %p1278_p8 = pneg %p1277_p9 }
  0x37   : > { %p1285_p12 = pnand %p1284_p11, %p1278_p8 }
  0x39   : > { %1288 = shalt.err (!%p1285_p12)
}
  0x3a   : > { %s2049_s29 = smov 64   ;;  %s2051_s18 = smov 4  }
  0x3b   : > { %1162 = dma.hbm_to_vmem [thread:$0]  (!%p1659_p2), %s2083_s4, 256, %s1651_s12, [#allocation12], %s2049_s29, %s2049_s29, %s2051_s18  }
  0x3c   : > { %s2122_s14 = smov (%p1667_p4, %s48_s14), 0  ;;  %s1706_s28 = sshll.u32 %s1665_s15, 3 }
  0x3d   : > { %2084 = sst [smem:[#allocation27_spill]] %s2122_s14  ;;  %s1709_s11 = sshll.u32 %s1531_s25, 7 }
  0x3e   : > { %s52_s17 = ssub.s32 %s1531_s25, %s2122_s14  ;;  %p2085_p3 = scmp.lt.s32.totalorder %s1535_s26, 2 }
  0x3f   : > { %p55_p8 = scmp.eq.s32.totalorder %s52_s17, 0  ;;  %s2056_s12 = sand.u32 1, %s1535_s26  }
  0x40   : > { %p1717_p7 = pnand %p2085_p3, %p1627_p5  ;;  %s2087_s16 = sadd.s32 1, %s1523_s23 }
  0x41   : > { %s1725_s19 = scalar_select %p55_p8, %s1523_s23, %s2087_s16  }
  0x42   : > { %s2086_s9 = scalar_select %p1717_p7, 1, 0 }
  0x43   : > { %2088 = sst [smem:[#allocation28_spill]] %s1725_s19  ;;  %s2089_s1 = sld [smem:[#allocation29_spill]] }
  0x44   : > { %s300_s30 = scalar_lea.vmem [#allocation8], %s1706_s28  ;;  %s1540_s14 = smov [#allocation14]  }
  0x45   : > { %s308_s4 = sshll.u32 %s300_s30, 4  ;;  %s1736_s21 = sshll.u32 %s1540_s14, 4  ;;  %s1734_s4 = int_to_ptr.vmem [resolvable:$true] %s308_s4  ;;  %s264_s21 = int_to_ptr.vmem [resolvable:$true] %s1736_s21 }
  0x46   : > { %s1740_s17 = scalar_lea.sflag [#allocation9], %s2056_s12  ;;  %p1746_p9 = pneg %p1717_p7 }
  0x48   : > { %s2090_s29 = scalar_select %p1746_p9, 1, 0 }
  0x49   : > { %s1731_s18 = scalar_lea.hbm %s2089_s1, %s1709_s11  ;;  %s1294_s19 = scalar_lea.hbm %s2089_s1, 256 }
  0x4a   : > { %s1289_s16 = scalar_lea.hbm %s1731_s18, 128  ;;  %p1295_p1 = scmp.lt.u32.totalorder %s1731_s18, %s2089_s1 }
  0x4b   : > { %p1290_p5 = scmp.ne.s32.totalorder %s1731_s18, %s1289_s16  ;;  %p1296_p4 = scmp.lt.u32.totalorder %s1294_s19, %s1289_s16 }
  0x4c   : > { %p1298_p6 = scmp.lt.u32.totalorder %s1289_s16, %s1731_s18 }
  0x4d   : > { %p1292_p12 = pnand %p1746_p9, %p1290_p5  ;;  %p1297_p13 = por %p1296_p4, %p1295_p1 }
  0x4f   : > { %p1293_p0 = pneg %p1292_p12  ;;  %p1299_p11 = por %p1298_p6, %p1297_p13 }
  0x51   : > { %p1300_p3 = pnand %p1299_p11, %p1293_p0 }
  0x53   : > { %1303 = shalt.err (!%p1300_p3)
}
  0x54   : > { %s1304_s12 = scalar_lea.vmem %s1734_s4, 128  ;;  %s1541_s20 = smov [#allocation8]  }
  0x55   : > { %p1305_p8 = scmp.ne.s32.totalorder %s1734_s4, %s1304_s12  ;;  %s1309_s30 = sshll.u32 %s1541_s20, 4  ;;  %s1310_s30 = int_to_ptr.vmem [resolvable:$false] %s1309_s30 }
  0x56   : > { %s1311_s23 = scalar_lea.vmem %s1310_s30, 256  ;;  %p1312_p10 = scmp.lt.s32.totalorder %s1734_s4, %s1310_s30 }
  0x57   : > { %p1307_p5 = pnand %p1305_p8, %p1746_p9  ;;  %p1313_p2 = scmp.lt.s32.totalorder %s1311_s23, %s1304_s12 }
  0x59   : > { %p1308_p12 = pneg %p1307_p5  ;;  %p1314_p1 = por %p1313_p2, %p1312_p10 }
  0x5b   : > { %p1315_p4 = pnand %p1314_p1, %p1308_p12 }
  0x5d   : > { %1318 = shalt.err (!%p1315_p4)
}
  0x5e   : > { %s2091_s19 = smov 4   ;;  %s2092_s16 = smov 64  }
  0x5f   : > { %1172 = dma.hbm_to_vmem [thread:$0]  (!%p1717_p7), %s1731_s18, 128, %s1734_s4, %s1740_s17, %s2092_s16, %s2092_s16, %s2091_s19  }
  0x60   : > { %s2093_s5 = sld [smem:[#allocation31_spill]]  ;;  %p2094_p10 = scmp.ne.s32.totalorder %s2081_s13, 0 }
  0x62   : > { %p2095_p0 = pneg %p2094_p10 }
  0x66   : > { %s1319_s30 = scalar_lea.hbm %s2093_s5, 16 }
  0x67   : > { %p1320_p2 = scmp.ne.s32.totalorder %s2093_s5, %s1319_s30  ;;  %p1326_p11 = scmp.lt.u32.totalorder %s1319_s30, %s2093_s5 }
  0x69   : > { %p1322_p13 = pnand %p1320_p2, %p2095_p0 }
  0x6b   : > { %p1323_p6 = pneg %p1322_p13 }
  0x6d   : > { %p1328_p3 = pnand %p1326_p11, %p1323_p6 }
  0x6f   : > { %1331 = shalt.err (!%p1328_p3)
}
  0x70   : > { %s1332_s4 = scalar_lea.vmem %s264_s21, 16  ;;  %p2096_p5 = pmov %p2095_p0 }
  0x71   : > { %p1333_p8 = scmp.ne.s32.totalorder %s264_s21, %s1332_s4  ;;  %s1339_s18 = scalar_lea.vmem %s264_s21, 32 }
  0x72   : > { %p1340_p4 = scmp.lt.s32.totalorder %s264_s21, %s264_s21  ;;  %p1341_p7 = scmp.lt.s32.totalorder %s1339_s18, %s1332_s4 }
  0x73   : > { %p1335_p12 = pnand %p1333_p8, %p2096_p5 }
  0x74   : > { %p1342_p9 = por %p1341_p7, %p1340_p4 }
  0x75   : > { %p1336_p1 = pneg %p1335_p12 }
  0x77   : > { %p1343_p0 = pnand %p1342_p9, %p1336_p1 }
  0x79   : > { %1346 = shalt.err (!%p1343_p0)
}
  0x7a   : > { %1165 = dma.hbm_to_vmem [thread:$0]  (!%p2094_p10), %s2093_s5, 16, %s264_s21, [#allocation15]  }
  0x7b   : > { %s1798_s30 = scalar_lea.hbm %s2037_s0, %s1709_s11  ;;  %s278_s12 = scalar_lea.vmem [#allocation5], %s1706_s28 }
  0x7c   : > { %s286_s13 = sshll.u32 %s278_s12, 4  ;;  %s1807_s18 = scalar_lea.hbm %s2039_s2, %s1709_s11  ;;  %s1801_s13 = int_to_ptr.vmem [resolvable:$true] %s286_s13 }
  0x7d   : > { %s275_s14 = scalar_lea.sflag [#allocation6], %s1665_s15  ;;  %s1347_s21 = scalar_lea.hbm %s1798_s30, 128 }
  0x7e   : > { %p1348_p7 = scmp.ne.s32.totalorder %s1798_s30, %s1347_s21  ;;  %p2097_p9 = scmp.ne.s32.totalorder %s2090_s29, 0 }
  0x7f   : > { %s1352_s20 = scalar_lea.hbm %s2037_s0, 256  ;;  %p1353_p13 = scmp.lt.u32.totalorder %s1798_s30, %s2037_s0 }
  0x80   : > { %p1350_p2 = pnand %p1348_p7, %p2097_p9  ;;  %p1354_p6 = scmp.lt.u32.totalorder %s1352_s20, %s1347_s21 }
  0x81   : > { %p1356_p3 = scmp.lt.u32.totalorder %s1347_s21, %s1798_s30 }
  0x82   : > { %p1351_p10 = pneg %p1350_p2  ;;  %p1355_p11 = por %p1354_p6, %p1353_p13 }
  0x84   : > { %p1357_p8 = por %p1356_p3, %p1355_p11 }
  0x86   : > { %p1358_p5 = pnand %p1357_p8, %p1351_p10 }
  0x88   : > { %1361 = shalt.err (!%p1358_p5)
}
  0x89   : > { %s1362_s11 = scalar_lea.vmem %s1801_s13, 128  ;;  %s1542_s12 = smov [#allocation5]  }
  0x8a   : > { %p1363_p12 = scmp.ne.s32.totalorder %s1801_s13, %s1362_s11  ;;  %s1367_s23 = sshll.u32 %s1542_s12, 4  ;;  %s1368_s23 = int_to_ptr.vmem [resolvable:$false] %s1367_s23 }
  0x8b   : > { %s1369_s5 = scalar_lea.vmem %s1368_s23, 256  ;;  %p1370_p0 = scmp.lt.s32.totalorder %s1801_s13, %s1368_s23 }
  0x8c   : > { %p1365_p1 = pnand %p1363_p12, %p2097_p9  ;;  %p1371_p7 = scmp.lt.s32.totalorder %s1369_s5, %s1362_s11 }
  0x8e   : > { %p1366_p4 = pneg %p1365_p1  ;;  %p1372_p2 = por %p1371_p7, %p1370_p0 }
  0x90   : > { %p1373_p13 = pnand %p1372_p2, %p1366_p4 }
  0x92   : > { %1376 = shalt.err (!%p1373_p13)
}
  0x93   : > { %p2098_p10 = scmp.ne.s32.totalorder %s2086_s9, 0  ;;  %s322_s8 = scalar_lea.vmem [#allocation10], %s1706_s28 }
  0x94   : > { %s330_s4 = sshll.u32 %s322_s8, 4  ;;  %s1067_s21 = sshll.u32 %s1665_s15, 2  ;;  %s1837_s4 = int_to_ptr.vmem [resolvable:$true] %s330_s4 }
  0x95   : > { %1169 = dma.hbm_to_vmem [thread:$0]  (!%p2098_p10), %s1798_s30, 128, %s1801_s13, %s275_s14, %s2092_s16, %s2092_s16, %s2091_s19  }
  0x96   : > { %s1377_s1 = scalar_lea.hbm %s1807_s18, 128  ;;  %s1382_s11 = scalar_lea.hbm %s2039_s2, 256 }
  0x97   : > { %p1378_p6 = scmp.ne.s32.totalorder %s1807_s18, %s1377_s1  ;;  %p1383_p8 = scmp.lt.u32.totalorder %s1807_s18, %s2039_s2 }
  0x98   : > { %p1384_p5 = scmp.lt.u32.totalorder %s1382_s11, %s1377_s1  ;;  %p1386_p1 = scmp.lt.u32.totalorder %s1377_s1, %s1807_s18 }
  0x99   : > { %p1380_p11 = pnand %p1378_p6, %p2097_p9 }
  0x9a   : > { %p1385_p12 = por %p1384_p5, %p1383_p8 }
  0x9b   : > { %p1381_p3 = pneg %p1380_p11 }
  0x9c   : > { %p1387_p4 = por %p1386_p1, %p1385_p12 }
  0x9e   : > { %p1388_p0 = pnand %p1387_p4, %p1381_p3 }
  0xa0   : > { %1391 = shalt.err (!%p1388_p0)
}
  0xa1   : > { %s1392_s28 = scalar_lea.vmem %s1837_s4, 128  ;;  %s1543_s30 = smov [#allocation10]  }
  0xa2   : > { %p1393_p7 = scmp.ne.s32.totalorder %s1837_s4, %s1392_s28  ;;  %s1397_s13 = sshll.u32 %s1543_s30, 4  ;;  %s1398_s13 = int_to_ptr.vmem [resolvable:$false] %s1397_s13 }
  0xa3   : > { %s1399_s14 = scalar_lea.vmem %s1398_s13, 256  ;;  %p1400_p6 = scmp.lt.s32.totalorder %s1837_s4, %s1398_s13 }
  0xa4   : > { %p1395_p2 = pnand %p1393_p7, %p2097_p9  ;;  %p1401_p11 = scmp.lt.s32.totalorder %s1399_s14, %s1392_s28 }
  0xa6   : > { %p1396_p13 = pneg %p1395_p2  ;;  %p1402_p8 = por %p1401_p11, %p1400_p6 }
  0xa8   : > { %p1403_p5 = pnand %p1402_p8, %p1396_p13 }
  0xaa   : > { %1406 = shalt.err (!%p1403_p5)
}
  0xab   : > { %1175 = dma.hbm_to_vmem [thread:$0]  (!%p2098_p10), %s1807_s18, 128, %s1837_s4, %s1740_s17, %s2092_s16, %s2092_s16, %s2091_s19  }
  0xac   : > { %s1068_s5 = sshll.u32 %s1531_s25, 6  ;;  %s344_s20 = scalar_lea.vmem [#allocation11], %s1067_s21 }
  0xad   : > { %s1869_s6 = scalar_lea.hbm %s2040_s3, %s1068_s5  ;;  %s353_s11 = sshll.u32 %s344_s20, 4  ;;  %s354_s11 = int_to_ptr.vmem [resolvable:$true] %s353_s11 }
  0xae   : > { %s2099_s12 = sand.u32 1, %s1535_s26   ;;  %s1407_s28 = scalar_lea.hbm %s1869_s6, 64 }
  0xaf   : > { %s341_s23 = scalar_lea.sflag [#allocation12], %s2099_s12  ;;  %p1408_p3 = scmp.ne.s32.totalorder %s1869_s6, %s1407_s28 }
  0xb0   : > { %s1412_s16 = scalar_lea.hbm %s2040_s3, 128  ;;  %p1413_p4 = scmp.lt.u32.totalorder %s1869_s6, %s2040_s3 }
  0xb1   : > { %p1410_p12 = pnand %p1408_p3, %p2097_p9  ;;  %p1414_p0 = scmp.lt.u32.totalorder %s1412_s16, %s1407_s28 }
  0xb2   : > { %p1416_p2 = scmp.lt.u32.totalorder %s1407_s28, %s1869_s6 }
  0xb3   : > { %p1411_p1 = pneg %p1410_p12  ;;  %p1415_p7 = por %p1414_p0, %p1413_p4 }
  0xb5   : > { %p1417_p13 = por %p1416_p2, %p1415_p7 }
  0xb7   : > { %p1418_p6 = pnand %p1417_p13, %p1411_p1 }
  0xb9   : > { %1421 = shalt.err (!%p1418_p6)
}
  0xba   : > { %s1422_s4 = scalar_lea.vmem %s354_s11, 64  ;;  %s1544_s21 = smov [#allocation11]  }
  0xbb   : > { %p1423_p11 = scmp.ne.s32.totalorder %s354_s11, %s1422_s4  ;;  %s1427_s30 = sshll.u32 %s1544_s21, 4  ;;  %s1428_s30 = int_to_ptr.vmem [resolvable:$false] %s1427_s30 }
  0xbc   : > { %s1429_s13 = scalar_lea.vmem %s1428_s30, 128  ;;  %p1430_p3 = scmp.lt.s32.totalorder %s354_s11, %s1428_s30 }
  0xbd   : > { %p1425_p8 = pnand %p1423_p11, %p2097_p9  ;;  %p1431_p12 = scmp.lt.s32.totalorder %s1429_s13, %s1422_s4 }
  0xbf   : > { %p1426_p5 = pneg %p1425_p8  ;;  %p1432_p10 = por %p1431_p12, %p1430_p3 }
  0xc1   : > { %p1433_p0 = pnand %p1432_p10, %p1426_p5 }
  0xc3   : > { %1436 = shalt.err (!%p1433_p0)
}
  0xc4   : > { %p2100_p4 = scmp.ne.s32.totalorder %s2086_s9, 0  ;;  %p2101_p1 = scmp.ne.s32.totalorder %s2080_s10, 0 }
  0xc5   : > { %s1895_s29 = sand.u32 (!%p2101_p1), 1, %s1519_s22   ;;  %p2102_p9 = scmp.ne.s32.totalorder (!%p2101_p1), %s2075_s7, 0 }
  0xc6   : > { %1178 = dma.hbm_to_vmem [thread:$0]  (!%p2100_p4), %s1869_s6, 64, %s354_s11, %s341_s23  }
  0xc7   : > { %362 = sbr.rel (%p2101_p1) target bundleno = 1264 (0x4f0), region = 44  ;;  %s1898_s14 = sshll.u32 (!%p2101_p1), %s1895_s29, 3 }
  0xc8   : > { %s365_s5 = scalar_lea.sflag (!%p2101_p1), [#allocation6], %s1895_s29  ;;  %s368_s8 = scalar_lea.vmem (!%p2101_p1), [#allocation5], %s1898_s14 }
  0xce   : > { %1490 = dma.done.wait (%p2102_p9), %s365_s5, 128  }
  0xcf   : > { %1492 = vsyncadd (%p2102_p9), %s365_s5, 4294967168  ;;  %s373_s9 = sand.u32 1, %s1616_s27   ;;  %s377_s1 = scalar_lea.vmem [#allocation8], %s1898_s14 }
  0xd0   : > { %s374_s10 = scalar_lea.sflag [#allocation9], %s373_s9 }
  0xd1   : > { %1494 = dma.done.wait (%p2102_p9), %s374_s10, 256  }
  0xd2   : > { %1496 = vsyncadd (%p2102_p9), %s374_s10, 4294967040  ;;  %s1073_s6 = sshll.u32 %s1895_s29, 2  ;;  %s386_s20 = scalar_lea.vmem [#allocation10], %s1898_s14 }
  0xd3   : > { %s392_s11 = scalar_lea.sflag [#allocation12], %s373_s9  ;;  %s1914_s12 = scalar_lea.vmem [#allocation11], %s1073_s6 }
  0xd4   : > { %1498 = dma.done.wait (%p2102_p9), %s392_s11, 64  }
  0xd5   : > { %1500 = vsyncadd (%p2102_p9), %s392_s11, 4294967232  ;;  %p2103_p10 = scmp.eq.s32.totalorder %s1616_s27, 0 }
  0xd7   : > { %1502 = dma.done.wait (%p2103_p10), [#allocation12], 256   ;;  %p2104_p7 = pmov %p2103_p10 }
  0xd9   : > { %1504 = vsyncadd (%p2104_p7), [#allocation12], 4294967040  ;;  %p2105_p2 = pmov %p2104_p7 }
  0xdb   : > { %1506 = dma.done.wait (%p2105_p2), [#allocation15], 16   ;;  %p2106_p13 = pmov %p2105_p2 }
  0xdc   : > { %vm457_vm0 = vcmask 130048   ;;  %v1545_v0 = vmov 0.0   ;;  %vm1546_vm1 = vmmov 0   ;;  %v462_v1 = vld [vmem:[%s377_s1] sm:$0xf]  ;;  %vm452_vm2 = vcmask 7168  }
  0xdd   : > { %1508 = vsyncadd (%p2106_p13), [#allocation15], 4294967280  ;;  %1105 = vmatprep.subr.bf16.mxu0 %v1545_v0  ;;  %458 = vst.msk [vmem:[#allocation4] sm:$0xff] %vm457_vm0, %v1545_v0  ;;  %1111 = vmatprep.subr.bf16.mxu1 %v1545_v0  ;;  %v463_v2 = vld [vmem:[%s377_s1 + $0x4] sm:$0xf]  ;;  %v471_v3 = vsel %vm457_vm0, %v462_v1, 0 }
  0xde   : > { %459 = vst.msk [vmem:[#allocation4 + $0x8] sm:$0xff] %vm457_vm0, %v1545_v0  ;;  %1107 = vmatprep.mubr.msk.bf16.mxu0 %vm1546_vm1, %v1545_v0  ;;  %1113 = vmatprep.mubr.msk.bf16.mxu1 %vm1546_vm1, %v1545_v0  ;;  %v517_v4 = vsel %vm457_vm0, %v463_v2, 0  ;;  %v460_v5 = vld [vmem:[%s368_s8] sm:$0xf]  ;;  %v461_v6 = vld [vmem:[%s368_s8 + $0x4] sm:$0xf] }
  0xdf   : > { %1106 = vmatpush3.bf16.xpose.msra.mxu0 %v471_v3  ;;  %1112 = vmatpush3.bf16.xpose.msra.mxu1 %v517_v4  ;;  %v1547_v7 = vmov -inf   ;;  %455 = vst.msk [vmem:[#allocation3] sm:$0xff] %vm452_vm2, %v1545_v0  ;;  %456 = vst.msk [vmem:[#allocation3 + $0x8] sm:$0xff] %vm452_vm2, %v1545_v0  ;;  %v464_v8 = vld [vmem:[%s1914_s12] sm:$0xf]  ;;  %vm563_vm3 = vcmask 64512  }
  0xe0   : > { %1117 = vmatprep.subr.bf16.mxu0 %v1545_v0  ;;  %1123 = vmatprep.subr.bf16.mxu1 %v1545_v0  ;;  %453 = vst.msk [vmem:[#allocation2] sm:$0xff] %vm452_vm2, %v1547_v7  ;;  %454 = vst.msk [vmem:[#allocation2 + $0x8] sm:$0xff] %vm452_vm2, %v1547_v7  ;;  %v465_v9 = vunpack.c.l.bf16 %v464_v8  ;;  %v1548_v24 = vmov 0   ;;  %v625_v33 = vld [vmem:[%s386_s20] sm:$0xf]  ;;  %vm630_vm4 = vcmask 1043456  }
  0xe1   : > { %1245 = vset.pattern.permute.xlu1 %v1548_v24  ;;  %1246 = vset.pattern.permute.xlu0 %v1548_v24  ;;  %v632_v34 = vsel %vm630_vm4, %v625_v33, 0  ;;  %v626_v35 = vld [vmem:[%s386_s20 + $0x4] sm:$0xf]  ;;  %s2107_s27 = sld [smem:[#allocation25_spill]]  ;;  %s1087_s7 = sshll.u32 %s1527_s24, 7  ;;  %vm860_vm5 = vcmask 261120  }
  0xe2   : > { %v678_v36 = vsel %vm630_vm4, %v626_v35, 0  ;;  %v1247_v1 = vld [vmem:[#allocation13 + $0x8] sm:$0xff]   ;;  %s446_s23 = scalar_lea.vmem [#allocation16], %s1898_s14  ;;  %s2108_s16 = sld [smem:[#allocation32_spill]] }
  0xe3   : > { %s877_s28 = sshll.u32 %s446_s23, 4  ;;  %s863_s24 = scalar_lea.sflag [#allocation7], %s1895_s29  ;;  %s1990_s28 = int_to_ptr.vmem [resolvable:$true] %s877_s28 }
  0xe4   : > { %v609_v3 = vld [vmem:[#allocation4] sm:$0xff]  ;;  %s1437_s15 = scalar_lea.vmem %s1990_s28, 128  ;;  %s1549_s4 = smov [#allocation16]  }
  0xe5   : > { %p1438_p6 = scmp.ne.s32.totalorder %s1990_s28, %s1437_s15  ;;  %s1441_s21 = sshll.u32 %s1549_s4, 4  ;;  %s1442_s21 = int_to_ptr.vmem [resolvable:$false] %s1441_s21 }
  0xe6   : > { %1108 = vmatmul.mubr.msk.bf16.vlgmr.msra.gmra.mrb[0].mxu0 %vm457_vm0, %v460_v5  ;;  %1114 = vmatmul.mubr.msk.bf16.vlgmr.msra.gmra.mrb[0].mxu1 %vm457_vm0, %v461_v6  ;;  %v594_v53 = vld [vmem:[#allocation3] sm:$0xff]  ;;  %v595_v56 = vld [vmem:[#allocation3 + $0x8] sm:$0xff]  ;;  %v610_v6 = vld [vmem:[#allocation4 + $0x8] sm:$0xff]  ;;  %s1443_s30 = scalar_lea.vmem %s1442_s21, 256  ;;  %p1444_p3 = scmp.lt.s32.totalorder %s1990_s28, %s1442_s21 }
  0xe7   : > { %1119 = vmatprep.mubr.msk.bf16.mxu0 %vm1546_vm1, %v1545_v0  ;;  %1125 = vmatprep.mubr.msk.bf16.mxu1 %vm1546_vm1, %v1545_v0  ;;  %v561_v25 = vld [vmem:[#allocation2] sm:$0xff]  ;;  %v562_v28 = vld [vmem:[#allocation2 + $0x8] sm:$0xff]  ;;  %p2109_p11 = scmp.ne.s32.totalorder %s2107_s27, 0  ;;  %p1445_p12 = scmp.lt.s32.totalorder %s1443_s30, %s1437_s15 }
  0xe8   : > { %1118 = vmatpush3.bf16.msra.mxu0 %v632_v34  ;;  %1124 = vmatpush3.bf16.msra.mxu1 %v678_v36  ;;  %s1988_s18 = scalar_lea.hbm %s2108_s16, %s1087_s7 }
  0xe9   : > { %1129 = vmatprep.subr.bf16.mxu0 %v1545_v0  ;;  %1135 = vmatprep.subr.bf16.mxu1 %v1545_v0  ;;  %p1439_p8 = pnand %p1438_p6, %p2109_p11  ;;  %p1446_p0 = por %p1445_p12, %p1444_p3 }
  0xeb   : > { %p1440_p5 = pneg %p1439_p8 }
  0xed   : > { %p1447_p4 = pnand %p1446_p0, %p1440_p5 }
 0x1b9   : > { %v507_v10 = vpop.f32.mrb[0].mxu0  ;;  %v553_v11 = vpop.f32.mrb[0].mxu1 }
 0x1ba   : > { %v508_v12 = vadd.f32 %v507_v10, %v465_v9  ;;  %v1109_v13 = vpop.f32.mrb[1].mxu0  ;;  %v554_v14 = vadd.f32 %v553_v11, %v465_v9  ;;  %v1115_v15 = vpop.f32.mrb[1].mxu1 }
 0x1bb   : > { %v510_v16 = vpop.f32.mrb[2].mxu0  ;;  %v556_v17 = vpop.f32.mrb[2].mxu1 }
 0x1bc   : > { %v559_v18 = vmul.f32 0.17677669, %v508_v12  ;;  %v560_v19 = vmul.f32 0.17677669, %v554_v14  ;;  %v1110_v20 = vpop.f32.mrb[3].mxu0  ;;  %v1116_v21 = vpop.f32.mrb[3].mxu1 }
 0x1be   : > { %v564_v22 = vsel %vm563_vm3, %v559_v18, -inf  ;;  %v567_v23 = vsel %vm563_vm3, %v560_v19, -inf }
 0x1bf   : > { %565 = vmax.xlane.f32.xlu0 %v564_v22 }
 0x1c3   : > { %568 = vmax.xlane.f32.xlu0 %v567_v23 }
 0x24c   : > { %v566_v26 = vpop.xlane.xlu0 %565 }
 0x24d   : > { %v570_v27 = vmax.f32 %v561_v25, %v566_v26 }
 0x24f   : > { %v572_v29 = vsub.f32 %v561_v25, %v570_v27  ;;  %724 = vst.msk [vmem:[#allocation2] sm:$0xff] %vm452_vm2, %v570_v27  ;;  %580 = vperm.xlu1 %1245, %v570_v27  }
 0x250   : > { %v569_v30 = vpop.xlane.xlu0 %568 }
 0x251   : > { %v571_v31 = vmax.f32 %v562_v28, %v569_v30  ;;  %v574_v50 = vmul.f32 1.442695, %v572_v29 }
 0x253   : > { %v573_v32 = vsub.f32 %v562_v28, %v571_v31  ;;  %725 = vst.msk [vmem:[#allocation2 + $0x8] sm:$0xff] %vm452_vm2, %v571_v31  ;;  %585 = vperm.xlu1 %1245, %v571_v31  }
 0x255   : > { %v576_v49 = vmul.f32 1.442695, %v573_v32  ;;  %v1085_v32 = vld [vmem:[#allocation14] ss:$0 sm:$0xff] }
 0x2ce   : > { %v581_v37 = vpop.permute.xlu1 %580 }
 0x2cf   : > { %v588_v38 = vsub.f32 %v559_v18, %v581_v37 }
 0x2d1   : > { %v590_v39 = vmul.f32 1.442695, %v588_v38 }
 0x2d2   : > { %v586_v40 = vpop.permute.xlu1 %585 }
 0x2d3   : > { %1249 = vpow2.f32 %v590_v39  ;;  %v589_v41 = vsub.f32 %v560_v19, %v586_v40 }
 0x2d5   : > { %v592_v42 = vmul.f32 1.442695, %v589_v41 }
 0x2d7   : > { %1251 = vpow2.f32 %v592_v42 }
 0x2d8   : > { %1253 = vpow2.f32 %v576_v49 }
 0x2d9   : > { %1255 = vpow2.f32 %v574_v50 }
 0x2dd   : > { %v1250_v43 = vpop.eup %1249 }
 0x2de   : > { %v598_v44 = vsel %vm563_vm3, %v1250_v43, 0.0  ;;  %v623_v45 = vpack.c.bf16 %v1250_v43, %v1250_v43 }
 0x2df   : > { %599 = vadd.xlane.f32.xlu0 %v598_v44 }
 0x2e0   : > { %1120 = vmatmul.mubr.msk.bf16.vlgmr.msra.gmra.mrb[4].mxu0 %vm563_vm3, %v623_v45 }
 0x2e1   : > { %v1252_v46 = vpop.eup %1251  ;;  %1131 = vmatprep.mubr.msk.bf16.mxu0 %vm1546_vm1, %v1545_v0  ;;  %1130 = vmatpush3.bf16.msra.mxu0 %v1247_v1 }
 0x2e2   : > { %v601_v47 = vsel %vm563_vm3, %v1252_v46, 0.0  ;;  %v624_v48 = vpack.c.bf16 %v1252_v46, %v1252_v46  ;;  %v1254_v51 = vpop.eup %1253 }
 0x2e3   : > { %602 = vadd.xlane.f32.xlu1 %v601_v47  ;;  %v1256_v52 = vpop.eup %1255  ;;  %v597_v58 = vmul.f32 %v1254_v51, %v595_v56 }
 0x2e4   : > { %1126 = vmatmul.mubr.msk.bf16.vlgmr.msra.gmra.mrb[4].mxu1 %vm563_vm3, %v624_v48  ;;  %v596_v54 = vmul.f32 %v1256_v52, %v594_v53 }
 0x2e5   : > { %1137 = vmatprep.mubr.msk.bf16.mxu1 %vm1546_vm1, %v1545_v0  ;;  %v1248_v0 = vld [vmem:[#allocation13] sm:$0xff]  }
 0x2e6   : > { %1136 = vmatpush3.bf16.msra.mxu1 %v1248_v0 }
 0x2f4   : > { %618 = vperm.xlu1 %1245, %v1254_v51  }
 0x2f5   : > { %613 = vperm.xlu0 %1246, %v1256_v52  }
 0x36c   : > { %v600_v55 = vpop.xlane.xlu0 %599 }
 0x36d   : > { %v604_v57 = vadd.f32 %v600_v55, %v596_v54 }
 0x36f   : > { %607 = vst.msk [vmem:[#allocation3] sm:$0xff] %vm452_vm2, %v604_v57 }
 0x370   : > { %v603_v59 = vpop.xlane.xlu1 %602 }
 0x371   : > { %v605_v60 = vadd.f32 %v603_v59, %v597_v58 }
 0x373   : > { %608 = vst.msk [vmem:[#allocation3 + $0x8] sm:$0xff] %vm452_vm2, %v605_v60 }
 0x374   : > { %v614_v4 = vpop.permute.xlu0 %613  ;;  %v619_v7 = vpop.permute.xlu1 %618 }
 0x375   : > { %v621_v5 = vmul.f32 %v614_v4, %v609_v3  ;;  %v622_v12 = vmul.f32 %v619_v7, %v610_v6 }
 0x376   : > { %v729_v61 = vld [vmem:[#allocation3] sm:$0xff] }
 0x377   : > { %1257 = vrcp.f32 %v729_v61 }
 0x37a   : > { %v730_v62 = vld [vmem:[#allocation3 + $0x8] sm:$0xff] }
 0x37b   : > { %1259 = vrcp.f32 %v730_v62 }
 0x381   : > { %v1258_v63 = vpop.eup %1257 }
 0x382   : > { %737 = vperm.xlu0 %1246, %v1258_v63  }
 0x385   : > { %v1260_v2 = vpop.eup %1259 }
 0x386   : > { %742 = vperm.xlu0 %1246, %v1260_v2  }
 0x3b3   : > { %v668_v8 = vpop.f32.mrb[4].mxu0 }
 0x3b4   : > { %v720_v9 = vadd.f32 %v668_v8, %v621_v5  ;;  %v1121_v10 = vpop.f32.mrb[5].mxu0 }
 0x3b5   : > { %v671_v11 = vpop.f32.mrb[6].mxu0 }
 0x3b6   : > { %722 = vst.msk [vmem:[#allocation4] sm:$0xff] %vm457_vm0, %v720_v9  ;;  %v1122_v13 = vpop.f32.mrb[7].mxu0 }
 0x3b7   : > { %v714_v14 = vpop.f32.mrb[4].mxu1 }
 0x3b8   : > { %v721_v15 = vadd.f32 %v714_v14, %v622_v12  ;;  %v1127_v16 = vpop.f32.mrb[5].mxu1 }
 0x3b9   : > { %v717_v17 = vpop.f32.mrb[6].mxu1 }
 0x3ba   : > { %723 = vst.msk [vmem:[#allocation4 + $0x8] sm:$0xff] %vm457_vm0, %v721_v15  ;;  %v1128_v18 = vpop.f32.mrb[7].mxu1 }
 0x3bd   : > { %v733_v19 = vld [vmem:[#allocation4] sm:$0xff] }
 0x3c1   : > { %v734_v23 = vld [vmem:[#allocation4 + $0x8] sm:$0xff] }
 0x401   : > { %v738_v20 = vpop.permute.xlu0 %737 }
 0x402   : > { %v745_v21 = vmul.f32 %v738_v20, %v733_v19 }
 0x404   : > { %v747_v22 = vpack.c.bf16 %v745_v21, %v745_v21 }
 0x405   : > { %v743_v24 = vpop.permute.xlu0 %742 }
 0x406   : > { %v746_v25 = vmul.f32 %v743_v24, %v734_v23  ;;  %1138 = vmatmul.mubr.msk.bf16.vlgmr.msra.gmra.mrb[8].mxu1 %vm457_vm0, %v747_v22 }
 0x408   : > { %v748_v26 = vpack.c.bf16 %v746_v25, %v746_v25 }
 0x40a   : > { %1132 = vmatmul.mubr.msk.bf16.vlgmr.msra.gmra.mrb[8].mxu0 %vm457_vm0, %v748_v26 }
 0x4d9   : > { %v846_v27 = vpop.f32.mrb[8].mxu1 }
 0x4da   : > { %v1139_v28 = vpop.f32.mrb[9].mxu1 }
 0x4db   : > { %v849_v29 = vpop.f32.mrb[10].mxu1 }
 0x4dc   : > { %v1140_v30 = vpop.f32.mrb[11].mxu1 }
 0x4dd   : > { %v797_v31 = vpop.f32.mrb[8].mxu0 }
 0x4de   : > { %v847_v33 = vadd.f32 %v846_v27, %v797_v31  ;;  %v1133_v34 = vpop.f32.mrb[9].mxu0 }
 0x4df   : > { %v800_v35 = vpop.f32.mrb[10].mxu0 }
 0x4e0   : > { %v859_v36 = vadd.f32 %v1085_v32, %v847_v33  ;;  %v1134_v37 = vpop.f32.mrb[11].mxu0 }
 0x4e2   : > { %861 = vst.msk [vmem:[%s446_s23] sm:$0xff] %vm860_vm5, %v859_v36 }
 0x4e3   : > { %1450 = shalt.err (!%p1447_p4)
}
 0x4e4   : > { %s1451_s13 = scalar_lea.hbm %s1988_s18, 128  ;;  %s1455_s5 = scalar_lea.hbm %s2108_s16, 256 }
 0x4e5   : > { %p1452_p1 = scmp.ne.s32.totalorder %s1988_s18, %s1451_s13  ;;  %p1456_p7 = scmp.lt.u32.totalorder %s1988_s18, %s2108_s16 }
 0x4e6   : > { %p1457_p2 = scmp.lt.u32.totalorder %s1455_s5, %s1451_s13  ;;  %p1459_p6 = scmp.lt.u32.totalorder %s1451_s13, %s1988_s18 }
 0x4e7   : > { %p1453_p9 = pnand %p1452_p1, %p2109_p11 }
 0x4e8   : > { %p1458_p13 = por %p1457_p2, %p1456_p7 }
 0x4e9   : > { %p1454_p10 = pneg %p1453_p9 }
 0x4ea   : > { %p1460_p8 = por %p1459_p6, %p1458_p13 }
 0x4ec   : > { %p1461_p5 = pnand %p1460_p8, %p1454_p10 }
 0x4ee   : > { %1464 = shalt.err (!%p1461_p5)
}
 0x4ef   : > { %1157 = dma.vmem_to_hbm [thread:$0]  (%p2109_p11), %s1990_s28, 128, %s1988_s18, %s863_s24  }
 0x4f0 PF: > { %s2110_s10 = sld [smem:[#allocation23_spill]]  ;;  %s2111_s1 = sld [smem:[#allocation26_spill]] }
 0x4f1   : > { %p2113_p12 = scmp.ge.s32.totalorder %s1535_s26, 2 }
 0x4f6   : > { %s889_s6 = sand.u32 1, %s2110_s10   ;;  %p2112_p3 = scmp.ne.s32.totalorder %s2111_s1, 0 }
 0x4f7   : > { %s890_s20 = scalar_lea.sflag [#allocation7], %s889_s6 }
 0x4f8   : > { %p1180_p0 = pnand %p2113_p12, %p2112_p3 }
 0x4fa   : > { %1510 = dma.done.wait (!%p1180_p0), %s890_s20, 128  }
 0x4fb   : > { %1512 = vsyncadd (!%p1180_p0), %s890_s20, 4294967168  ;;  %s29_s26 = sadd.s32 1, %s1535_s26   ;;  %s2114_s11 = sld [smem:[#allocation24_spill]] }
 0x4fc   : > { %p26_p4 = scmp.ge.s32.totalorder %s29_s26, 4   ;;  %s2115_s23 = sld [smem:[#allocation28_spill]] }
 0x4fd   : > { %s2116_s12 = sld [smem:[#allocation27_spill]]  ;;  %s2117_s21 = smov %s1519_s22 }
 0x4fe   : > { %s2119_s24 = smov %s1531_s25  ;;  %28 = sbr.rel (!%p26_p4) target bundleno = 16 (0x10), region = 143 }
 0x501   : > { %s2118_s22 = smov %s2114_s11 }
 0x503   : > { %s2120_s25 = smov %s2116_s12 }
 0x505   :  { %895 = vsyncpa [#allocation6], 1 }
 0x506   :  { %897 = vsyncpa [#allocation6 + $0x1], 1 }
 0x507   :  { %898 = vsyncpa [#allocation9], 1 }
 0x508   :  { %900 = vsyncpa [#allocation9 + $0x1], 1 }
 0x509   :  { %901 = vsyncpa [#allocation12], 1 }
 0x50a   :  { %903 = vsyncpa [#allocation12 + $0x1], 1 }
 0x50b   :  { %904 = vsyncpa [#allocation15], 1 }
 0x50c   :  { %905 = vsyncpa [#allocation7], 1 }
 0x50d   :  { %907 = vsyncpa [#allocation7 + $0x1], 1 }

</bundles_post_ra>
